<compile_context>
chip_gen: v6e
topology: v6e:2x2x1
jax: 0.10.0
libtpu: 0.0.40
codegen_flags: <defaults>
</compile_context>

<pallas_src>
import functools
import math

import numpy as np

import jax
import jax.numpy as jnp
from jax import lax
from jax.experimental import pallas as pl
from jax.experimental.pallas import tpu as pltpu

# ---- constants matching the PyTorch script ---------------------------------
MEAN = (0.485, 0.456, 0.406)
STD = (0.229, 0.224, 0.225)
SIGMA = 0.25          # args.sigma has no default in the snippet; pick 0.25
NUM_CLASSES = 10


def _round_up(x, m):
    return (x + m - 1) // m * m


def _largest_tile(total, base, cap):
    """Largest multiple of `base` that divides `total` and is <= cap."""
    d = total // base
    best = 1
    f = 1
    while f * f <= d:
        if d % f == 0:
            for g in (f, d // f):
                if g * base <= cap:
                    best = max(best, g)
        f += 1
    return best * base


def _mix32(h):
    """lowbias32-style 32-bit avalanche mixer (uint32 -> uint32)."""
    h = h ^ (h >> 16)
    h = h * jnp.uint32(0x21F0AAAD)
    h = h ^ (h >> 15)
    h = h * jnp.uint32(0x735A2D97)
    h = h ^ (h >> 15)
    return h


# ---- fused kernel: normalize + Gaussian noise + linear head -----------------
def _fused_defence_kernel(seed_ref, x_ref, scale_ref, shift_ref, w_ref, b_ref,
                          o_ref, *, sigma, tk, k_pad, w_resident, use_hw_prng,
                          eup_dtype):
    m = pl.program_id(0)
    k = pl.program_id(1)
    nk = pl.num_programs(1)
    tm = x_ref.shape[0]
    half = tk // 2            # tk is a multiple of 256 -> halves are lane-aligned

    # k is the inner ("arbitrary") reduction axis; the output block index is
    # constant over it, so o_ref stays VMEM-resident and we accumulate into it.
    @pl.when(k == 0)
    def _():
        o_ref[...] = jnp.zeros_like(o_ref)

    # ---- random bits: one uint32 per element of the (tm, tk) tile ----------
    if use_hw_prng:
        # Hardware PRNG, independent stream per (batch-tile, K-tile).
        pltpu.prng_seed(seed_ref[0], m, k)
        bits = lax.bitcast_convert_type(pltpu.prng_random_bits((tm, tk)),
                                        jnp.uint32)
    else:
        # Portable counter-based hash (no TPU-only primitives): avalanche-mix
        # the global element index combined with the seed.
        row = lax.broadcasted_iota(jnp.int32, (tm, tk), 0)
        col = lax.broadcasted_iota(jnp.int32, (tm, tk), 1)
        gidx = (m * tm + row) * k_pad + (k * tk + col)
        gidx = gidx * jnp.int32(-1640531527) + seed_ref[0]      # 0x9E3779B9
        bits = _mix32(lax.bitcast_convert_type(gidx, jnp.uint32))

    # ---- Box-Muller: 2 normals per bit pair (use BOTH cos and sin) ---------
    # Exponent bit-trick: (bits >> 9) | 0x3F800000 reinterpreted as f32 is
    # uniform in [1, 2): no int->float converts, 23 random mantissa bits.
    fb = lax.bitcast_convert_type((bits >> 9) | jnp.uint32(0x3F800000),
                                  jnp.float32)
    u1 = 2.0 - fb[:, :half]                        # (0, 1] -> log() is safe
    th = (2.0 * math.pi) * (fb[:, half:] - 1.0)    # uniform angle in [0, 2pi)
    # Transcendentals in bf16 on v6e/v7x (bf16 EUP), f32 on v5e / CPU.
    u1 = u1.astype(eup_dtype)
    th = th.astype(eup_dtype)
    r = jnp.sqrt(-2.0 * jnp.log(u1))
    zc = (r * jnp.cos(th)).astype(jnp.float32)
    zs = (r * jnp.sin(th)).astype(jnp.float32)

    # ---- normalize ((x-mean)/std == x*scale + shift) + noise in f32 --------
    x1 = x_ref[:, :half].astype(jnp.float32)
    x2 = x_ref[:, half:].astype(jnp.float32)
    a1 = x1 * scale_ref[:, :half] + shift_ref[:, :half] + sigma * zc
    a2 = x2 * scale_ref[:, half:] + shift_ref[:, half:] + sigma * zs

    # Two half-K dots (no concatenate of the cos/sin halves); only the MXU
    # operands are bf16, the accumulator stays f32.
    k0 = k * tk if w_resident else 0
    w1 = w_ref[pl.ds(k0, half), :]
    w2 = w_ref[pl.ds(k0 + half, half), :]
    o_ref[...] += (
        jnp.dot(a1.astype(jnp.bfloat16), w1, preferred_element_type=jnp.float32)
        + jnp.dot(a2.astype(jnp.bfloat16), w2,
                  preferred_element_type=jnp.float32))

    @pl.when(k == nk - 1)
    def _():
        o_ref[...] += b_ref[...]


# ---- end-to-end forward -----------------------------------------------------
def defence_forward(x_nchw, w, b, seed=0, *, sigma=SIGMA):
    N, C, H, W_ = x_nchw.shape
    assert C == len(MEAN), "ImageNet normalize expects 3 channels"
    hw = H * W_
    K = C * hw
    assert w.shape[0] == K
    nc = w.shape[1]
    n_out = _round_up(nc, 128)          # lane-dense logits (pad classes to 128)

    # --- backend-dependent strategy -----------------------------------------
    use_hw_prng = jax.default_backend() == "tpu"
    kind = jax.devices()[0].device_kind.lower()
    eup_dtype = jnp.bfloat16 if ("v6" in kind or "v7" in kind) else jnp.float32

    # --- batch tiling: >=2 m tiles when the batch allows (v7x megacore) -----
    n_pad = _round_up(N, 8)
    if n_pad >= 16:
        tm = min(256, _round_up(n_pad // 2, 8))
        n_pad = _round_up(n_pad, tm)
    else:
        tm = n_pad                      # tiny batch: single tile

    # --- K tiling: tk | k_pad, multiple of 256, as large as comfortably fits -
    k_pad = K if K % 256 == 0 else _round_up(K, 256)   # pad only if unavoidable
    tk_cap = max(256, min(8192, ((1 << 20) // tm) // 256 * 256))
    tk = _largest_tile(k_pad, 256, tk_cap)
    grid_m = n_pad // tm
    grid_k = k_pad // tk

    # --- operands: no full-tensor copies unless padding is unavoidable ------
    x_flat = x_nchw.reshape(N, K)                 # free metadata-only reshape
    if not jnp.issubdtype(x_flat.dtype, jnp.floating):
        x_flat = x_flat.astype(jnp.float32)
    # NOTE: feed bf16 images when the producer allows it; x is the dominant
    # HBM stream and bf16 halves its DMA time (the kernel upcasts internally).
    if n_pad != N or k_pad != K:
        x_flat = jnp.pad(x_flat, ((0, n_pad - N), (0, k_pad - K)))

    mean = jnp.asarray(MEAN, jnp.float32)
    inv_std = 1.0 / jnp.asarray(STD, jnp.float32)
    scale = jnp.repeat(inv_std, hw)
    shift = jnp.repeat(-mean * inv_std, hw)
    if k_pad != K:
        scale = jnp.pad(scale, (0, k_pad - K))
        shift = jnp.pad(shift, (0, k_pad - K))
    scale = scale.reshape(1, k_pad)
    shift = shift.reshape(1, k_pad)

    w_p = jnp.pad(w.astype(jnp.float32),
                  ((0, k_pad - K), (0, n_out - nc))).astype(jnp.bfloat16)
    b_p = jnp.pad(b.astype(jnp.float32), (0, n_out - nc)).reshape(1, n_out)
    seed_arr = jnp.asarray([seed], dtype=jnp.int32)

    # --- W residency: reuse W across batch tiles when it fits in VMEM -------
    w_bytes = k_pad * n_out * 2
    w_resident = (grid_m > 1) and (2 * w_bytes <= 16 * 1024 * 1024)
    if w_resident:
        w_spec = pl.BlockSpec((k_pad, n_out), lambda m, k, seed: (0, 0))
    else:
        w_spec = pl.BlockSpec((tk, n_out), lambda m, k, seed: (k, 0))

    # --- explicit VMEM budget (v7x has only 64 MiB physical) ----------------
    x_blk = tm * tk * x_flat.dtype.itemsize
    w_blk = (k_pad if w_resident else tk) * n_out * 2
    temps = 6 * tm * (tk // 2) * 4          # live f32 half-tiles in the body
    est = 2 * (x_blk + 2 * tk * 4) + 2 * w_blk + tm * n_out * 4 + temps
    vmem_limit = int(min(48 * 2 ** 20, max(32 * 2 ** 20, 1.5 * est)))

    kernel = functools.partial(
        _fused_defence_kernel, sigma=float(sigma), tk=tk, k_pad=k_pad,
        w_resident=w_resident, use_hw_prng=use_hw_prng, eup_dtype=eup_dtype)

    cost = pl.CostEstimate(
        flops=int(2 * n_pad * k_pad * n_out + 12 * n_pad * k_pad),
        transcendentals=int(2 * n_pad * k_pad),
        bytes_accessed=int(x_flat.size * x_flat.dtype.itemsize
                           + (1 if w_resident else grid_m) * w_p.size * 2
                           + n_pad * n_out * 4 + 2 * k_pad * 4 + n_out * 4),
    )

    out = pl.pallas_call(
        kernel,
        out_shape=jax.ShapeDtypeStruct((n_pad, n_out), jnp.float32),
        grid_spec=pltpu.PrefetchScalarGridSpec(
            num_scalar_prefetch=1,
            grid=(grid_m, grid_k),
            in_specs=[
                pl.BlockSpec((tm, tk), lambda m, k, seed: (m, k)),    # x
                pl.BlockSpec((1, tk), lambda m, k, seed: (0, k)),     # scale
                pl.BlockSpec((1, tk), lambda m, k, seed: (0, k)),     # shift
                w_spec,                                               # W
                pl.BlockSpec((1, n_out), lambda m, k, seed: (0, 0)),  # bias
            ],
            out_specs=pl.BlockSpec((tm, n_out), lambda m, k, seed: (m, 0)),
        ),
        compiler_params=pltpu.CompilerParams(
            dimension_semantics=("parallel", "arbitrary"),
            vmem_limit_bytes=vmem_limit),
        cost_estimate=cost,
    )(seed_arr, x_flat, scale, shift, w_p, b_p)

    return out[:N, :nc]


if __name__ == "__main__":
    key = jax.random.PRNGKey(0)
    kx, kw, kb, kx2 = jax.random.split(key, 4)

    # Small demo consistent with the module: batch=2, 3-channel 16x16 images.
    N, C, H, W = 2, 3, 16, 16
    x = jax.random.uniform(kx, (N, C, H, W), dtype=jnp.float32)
    x = x.astype(jnp.bfloat16)      # bf16 image stream (halves the HBM traffic)
    w = jax.random.normal(kw, (C * H * W, NUM_CLASSES), dtype=jnp.float32) * 0.02
    b = jax.random.normal(kb, (NUM_CLASSES,), dtype=jnp.float32) * 0.01

    out = jax.block_until_ready(defence_forward(x, w, b, seed=0))
    assert out.shape == (N, NUM_CLASSES) and out.dtype == jnp.float32
    assert bool(jnp.all(jnp.isfinite(out)))

    # Deterministic check: with sigma=0 the kernel is exactly normalize+linear.
    out0 = jax.block_until_ready(defence_forward(x, w, b, seed=0, sigma=0.0))
    xf = x.reshape(N, -1).astype(jnp.float32)
    mean_v = jnp.repeat(jnp.asarray(MEAN, jnp.float32), H * W)
    std_v = jnp.repeat(jnp.asarray(STD, jnp.float32), H * W)
    ref = ((xf - mean_v) / std_v) @ w + b
    np.testing.assert_allclose(np.asarray(out0), np.asarray(ref),
                               rtol=5e-2, atol=5e-2)

    # Larger (still small) shape exercising >=2 batch tiles, multiple K tiles
    # and the VMEM-resident-W path.
    N2, H2, W2 = 16, 64, 64
    x2 = jax.random.uniform(kx2, (N2, C, H2, W2),
                            dtype=jnp.float32).astype(jnp.bfloat16)
    w2 = jax.random.normal(kw, (C * H2 * W2, NUM_CLASSES),
                           dtype=jnp.float32) * 0.02
    out2 = jax.block_until_ready(defence_forward(x2, w2, b, seed=1))
    assert out2.shape == (N2, NUM_CLASSES)
    assert bool(jnp.all(jnp.isfinite(out2)))

    print("KERNEL_OK")
</pallas_src>

<mosaic_0001>
module attributes {stable_mosaic.version = 11 : i64} {
  func.func @_fused_defence_kernel(%arg0: i32, %arg1: i32, %arg2: memref<1xi32, #tpu.memory_space<smem>>, %arg3: memref<8x768xbf16, #tpu.memory_space<vmem>>, %arg4: memref<1x768xf32, #tpu.memory_space<vmem>>, %arg5: memref<1x768xf32, #tpu.memory_space<vmem>>, %arg6: memref<768x128xbf16, #tpu.memory_space<vmem>>, %arg7: memref<1x128xf32, #tpu.memory_space<vmem>>, %arg8: memref<8x128xf32, #tpu.memory_space<vmem>>) attributes {dimension_semantics = [#tpu.dimension_semantics<parallel>, #tpu.dimension_semantics<arbitrary>], iteration_bounds = array<i64: 1, 1>, scalar_prefetch = 1 : i64, scratch_operands = 0 : i64, tpu.core_type = #tpu.core_type<tc>, window_params = [{transform_indices = @transform_0, window_bounds = array<i64: 8, 768>}, {transform_indices = @transform_1, window_bounds = array<i64: 1, 768>}, {transform_indices = @transform_2, window_bounds = array<i64: 1, 768>}, {transform_indices = @transform_3, window_bounds = array<i64: 768, 128>}, {pipeline_mode = #tpu.pipeline_mode<synchronous>, transform_indices = @transform_4, window_bounds = array<i64: 1, 128>}, {transform_indices = @transform_5, window_bounds = array<i64: 8, 128>}]} {
    %c0_i32 = arith.constant 0 : i32
    %0 = arith.cmpi eq, %arg1, %c0_i32 : i32
    %1 = arith.extui %0 : i1 to i32
    %c0_i32_0 = arith.constant 0 : i32
    %2 = arith.cmpi ne, %1, %c0_i32_0 : i32
    scf.if %2 {
      %cst_31 = arith.constant 0.000000e+00 : f32
      %89 = vector.broadcast %cst_31 : f32 to vector<8x128xf32>
      %c0_32 = arith.constant 0 : index
      %c0_33 = arith.constant 0 : index
      %90 = vector.load %arg8[%c0_32, %c0_33] : memref<8x128xf32, #tpu.memory_space<vmem>>, vector<8x128xf32>
      tpu.vector_store %arg8[%c0_32, %c0_33], %89 {strides = array<i32>} : memref<8x128xf32, #tpu.memory_space<vmem>>, vector<8x128xf32>,
    } else {
    }
    %3 = tpu.iota {dimensions = array<i32: 0>} : vector<8x768xi32>
    %4 = tpu.iota {dimensions = array<i32: 1>} : vector<8x768xi32>
    %c8_i32 = arith.constant 8 : i32
    %5 = arith.muli %arg0, %c8_i32 : i32
    %6 = vector.broadcast %5 : i32 to vector<8x768xi32>
    %7 = arith.addi %6, %3 : vector<8x768xi32>
    %c768_i32 = arith.constant 768 : i32
    %8 = vector.broadcast %c768_i32 : i32 to vector<8x768xi32>
    %9 = arith.muli %7, %8 : vector<8x768xi32>
    %c768_i32_1 = arith.constant 768 : i32
    %10 = arith.muli %arg1, %c768_i32_1 : i32
    %11 = vector.broadcast %10 : i32 to vector<8x768xi32>
    %12 = arith.addi %11, %4 : vector<8x768xi32>
    %13 = arith.addi %9, %12 : vector<8x768xi32>
    %c-1640531527_i32 = arith.constant -1640531527 : i32
    %14 = vector.broadcast %c-1640531527_i32 : i32 to vector<8x768xi32>
    %15 = arith.muli %13, %14 : vector<8x768xi32>
    %c0 = arith.constant 0 : index
    %16 = memref.load %arg2[%c0] : memref<1xi32, #tpu.memory_space<smem>>
    %17 = vector.broadcast %16 : i32 to vector<8x768xi32>
    %18 = arith.addi %15, %17 : vector<8x768xi32>
    %19 = tpu.bitcast %18 : vector<8x768xi32> -> vector<8x768xi32>
    %c16_i32 = arith.constant 16 : i32
    %20 = vector.broadcast %c16_i32 : i32 to vector<8x768xi32>
    %21 = arith.shrui %19, %20 : vector<8x768xi32>
    %22 = arith.xori %19, %21 : vector<8x768xi32>
    %c569420461_i32 = arith.constant 569420461 : i32
    %23 = vector.broadcast %c569420461_i32 : i32 to vector<8x768xi32>
    %24 = arith.muli %22, %23 : vector<8x768xi32>
    %c15_i32 = arith.constant 15 : i32
    %25 = vector.broadcast %c15_i32 : i32 to vector<8x768xi32>
    %26 = arith.shrui %24, %25 : vector<8x768xi32>
    %27 = arith.xori %24, %26 : vector<8x768xi32>
    %c1935289751_i32 = arith.constant 1935289751 : i32
    %28 = vector.broadcast %c1935289751_i32 : i32 to vector<8x768xi32>
    %29 = arith.muli %27, %28 : vector<8x768xi32>
    %c15_i32_2 = arith.constant 15 : i32
    %30 = vector.broadcast %c15_i32_2 : i32 to vector<8x768xi32>
    %31 = arith.shrui %29, %30 : vector<8x768xi32>
    %32 = arith.xori %29, %31 : vector<8x768xi32>
    %c9_i32 = arith.constant 9 : i32
    %33 = vector.broadcast %c9_i32 : i32 to vector<8x768xi32>
    %34 = arith.shrui %32, %33 : vector<8x768xi32>
    %c1065353216_i32 = arith.constant 1065353216 : i32
    %35 = vector.broadcast %c1065353216_i32 : i32 to vector<8x768xi32>
    %36 = arith.ori %34, %35 : vector<8x768xi32>
    %37 = tpu.bitcast %36 : vector<8x768xi32> -> vector<8x768xf32>
    %38 = vector.extract_strided_slice %37 {offsets = [0, 0], sizes = [8, 384], strides = [1, 1]} : vector<8x768xf32> to vector<8x384xf32>
    %cst = arith.constant 2.000000e+00 : f32
    %39 = vector.broadcast %cst : f32 to vector<8x384xf32>
    %40 = arith.subf %39, %38 : vector<8x384xf32>
    %41 = vector.extract_strided_slice %37 {offsets = [0, 384], sizes = [8, 384], strides = [1, 1]} : vector<8x768xf32> to vector<8x384xf32>
    %cst_3 = arith.constant 1.000000e+00 : f32
    %42 = vector.broadcast %cst_3 : f32 to vector<8x384xf32>
    %43 = arith.subf %41, %42 : vector<8x384xf32>
    %cst_4 = arith.constant 6.28318548 : f32
    %44 = vector.broadcast %cst_4 : f32 to vector<8x384xf32>
    %45 = arith.mulf %44, %43 : vector<8x384xf32>
    %46 = math.log %40 : vector<8x384xf32>
    %cst_5 = arith.constant -2.000000e+00 : f32
    %47 = vector.broadcast %cst_5 : f32 to vector<8x384xf32>
    %48 = arith.mulf %47, %46 : vector<8x384xf32>
    %49 = math.sqrt %48 : vector<8x384xf32>
    %50 = math.cos %45 : vector<8x384xf32>
    %51 = arith.mulf %49, %50 : vector<8x384xf32>
    %52 = math.sin %45 : vector<8x384xf32>
    %53 = arith.mulf %49, %52 : vector<8x384xf32>
    %c0_6 = arith.constant 0 : index
    %c0_7 = arith.constant 0 : index
    %54 = vector.load %arg3[%c0_6, %c0_7] : memref<8x768xbf16, #tpu.memory_space<vmem>>, vector<8x384xbf16>
    %55 = arith.extf %54 : vector<8x384xbf16> to vector<8x384xf32>
    %c0_8 = arith.constant 0 : index
    %c384 = arith.constant 384 : index
    %56 = vector.load %arg3[%c0_8, %c384] : memref<8x768xbf16, #tpu.memory_space<vmem>>, vector<8x384xbf16>
    %57 = arith.extf %56 : vector<8x384xbf16> to vector<8x384xf32>
    %c0_9 = arith.constant 0 : index
    %c0_10 = arith.constant 0 : index
    %58 = vector.load %arg4[%c0_9, %c0_10] : memref<1x768xf32, #tpu.memory_space<vmem>>, vector<1x384xf32>
    %59 = vector.broadcast %58 : vector<1x384xf32> to vector<8x384xf32>
    %60 = arith.mulf %55, %59 : vector<8x384xf32>
    %c0_11 = arith.constant 0 : index
    %c0_12 = arith.constant 0 : index
    %61 = vector.load %arg5[%c0_11, %c0_12] : memref<1x768xf32, #tpu.memory_space<vmem>>, vector<1x384xf32>
    %62 = vector.broadcast %61 : vector<1x384xf32> to vector<8x384xf32>
    %63 = arith.addf %60, %62 : vector<8x384xf32>
    %cst_13 = arith.constant 2.500000e-01 : f32
    %64 = vector.broadcast %cst_13 : f32 to vector<8x384xf32>
    %65 = arith.mulf %64, %51 : vector<8x384xf32>
    %66 = arith.addf %63, %65 : vector<8x384xf32>
    %c0_14 = arith.constant 0 : index
    %c384_15 = arith.constant 384 : index
    %67 = vector.load %arg4[%c0_14, %c384_15] : memref<1x768xf32, #tpu.memory_space<vmem>>, vector<1x384xf32>
    %68 = vector.broadcast %67 : vector<1x384xf32> to vector<8x384xf32>
    %69 = arith.mulf %57, %68 : vector<8x384xf32>
    %c0_16 = arith.constant 0 : index
    %c384_17 = arith.constant 384 : index
    %70 = vector.load %arg5[%c0_16, %c384_17] : memref<1x768xf32, #tpu.memory_space<vmem>>, vector<1x384xf32>
    %71 = vector.broadcast %70 : vector<1x384xf32> to vector<8x384xf32>
    %72 = arith.addf %69, %71 : vector<8x384xf32>
    %cst_18 = arith.constant 2.500000e-01 : f32
    %73 = vector.broadcast %cst_18 : f32 to vector<8x384xf32>
    %74 = arith.mulf %73, %53 : vector<8x384xf32>
    %75 = arith.addf %72, %74 : vector<8x384xf32>
    %c0_19 = arith.constant 0 : index
    %c0_20 = arith.constant 0 : index
    %76 = vector.load %arg6[%c0_19, %c0_20] : memref<768x128xbf16, #tpu.memory_space<vmem>>, vector<384x128xbf16>
    %c384_21 = arith.constant 384 : index
    %c0_22 = arith.constant 0 : index
    %77 = vector.load %arg6[%c384_21, %c0_22] : memref<768x128xbf16, #tpu.memory_space<vmem>>, vector<384x128xbf16>
    %c0_23 = arith.constant 0 : index
    %c0_24 = arith.constant 0 : index
    %78 = vector.load %arg8[%c0_23, %c0_24] : memref<8x128xf32, #tpu.memory_space<vmem>>, vector<8x128xf32>
    %79 = arith.truncf %66 : vector<8x384xf32> to vector<8x384xbf16>
    %cst_25 = arith.constant dense<0.000000e+00> : vector<8x128xf32>
    %80 = tpu.matmul %79, %76, %cst_25 {dimension_numbers = #tpu.dot_dimension_numbers<[1], [0], [0], [1], [0, 0, 1, 1], [], []>} : vector<8x384xbf16>, vector<384x128xbf16>, vector<8x128xf32> -> vector<8x128xf32>
    %81 = arith.truncf %75 : vector<8x384xf32> to vector<8x384xbf16>
    %cst_26 = arith.constant dense<0.000000e+00> : vector<8x128xf32>
    %82 = tpu.matmul %81, %77, %cst_26 {dimension_numbers = #tpu.dot_dimension_numbers<[1], [0], [0], [1], [0, 0, 1, 1], [], []>} : vector<8x384xbf16>, vector<384x128xbf16>, vector<8x128xf32> -> vector<8x128xf32>
    %83 = arith.addf %80, %82 : vector<8x128xf32>
    %84 = arith.addf %78, %83 : vector<8x128xf32>
    %c0_27 = arith.constant 0 : index
    %c0_28 = arith.constant 0 : index
    %85 = vector.load %arg8[%c0_27, %c0_28] : memref<8x128xf32, #tpu.memory_space<vmem>>, vector<8x128xf32>
    tpu.vector_store %arg8[%c0_27, %c0_28], %84 {strides = array<i32>} : memref<8x128xf32, #tpu.memory_space<vmem>>, vector<8x128xf32>,
    %c0_i32_29 = arith.constant 0 : i32
    %86 = arith.cmpi eq, %arg1, %c0_i32_29 : i32
    %87 = arith.extui %86 : i1 to i32
    %c0_i32_30 = arith.constant 0 : i32
    %88 = arith.cmpi ne, %87, %c0_i32_30 : i32
    scf.if %88 {
      %c0_31 = arith.constant 0 : index
      %c0_32 = arith.constant 0 : index
      %89 = vector.load %arg8[%c0_31, %c0_32] : memref<8x128xf32, #tpu.memory_space<vmem>>, vector<8x128xf32>
      %c0_33 = arith.constant 0 : index
      %c0_34 = arith.constant 0 : index
      %90 = vector.load %arg7[%c0_33, %c0_34] : memref<1x128xf32, #tpu.memory_space<vmem>>, vector<1x128xf32>
      %91 = vector.broadcast %90 : vector<1x128xf32> to vector<8x128xf32>
      %92 = arith.addf %89, %91 : vector<8x128xf32>
      %c0_35 = arith.constant 0 : index
      %c0_36 = arith.constant 0 : index
      %93 = vector.load %arg8[%c0_35, %c0_36] : memref<8x128xf32, #tpu.memory_space<vmem>>, vector<8x128xf32>
      tpu.vector_store %arg8[%c0_35, %c0_36], %92 {strides = array<i32>} : memref<8x128xf32, #tpu.memory_space<vmem>>, vector<8x128xf32>,
    } else {
    }
    return
  }
  func.func @transform_0(%arg0: i32, %arg1: i32, %arg2: memref<1xi32, #tpu.memory_space<smem>>) -> (i32, i32) {
    %c0_i32 = arith.constant 0 : i32
    return %arg0, %arg1 : i32, i32
  }
  func.func @transform_1(%arg0: i32, %arg1: i32, %arg2: memref<1xi32, #tpu.memory_space<smem>>) -> (i32, i32) {
    %c0_i32 = arith.constant 0 : i32
    %c0_i32_0 = arith.constant 0 : i32
    return %c0_i32, %arg1 : i32, i32
  }
  func.func @transform_2(%arg0: i32, %arg1: i32, %arg2: memref<1xi32, #tpu.memory_space<smem>>) -> (i32, i32) {
    %c0_i32 = arith.constant 0 : i32
    %c0_i32_0 = arith.constant 0 : i32
    return %c0_i32, %arg1 : i32, i32
  }
  func.func @transform_3(%arg0: i32, %arg1: i32, %arg2: memref<1xi32, #tpu.memory_space<smem>>) -> (i32, i32) {
    %c0_i32 = arith.constant 0 : i32
    %c0_i32_0 = arith.constant 0 : i32
    return %arg1, %c0_i32 : i32, i32
  }
  func.func @transform_4(%arg0: i32, %arg1: i32, %arg2: memref<1xi32, #tpu.memory_space<smem>>) -> (i32, i32) {
    %c0_i32 = arith.constant 0 : i32
    %c0_i32_0 = arith.constant 0 : i32
    %c0_i32_1 = arith.constant 0 : i32
    return %c0_i32, %c0_i32_0 : i32, i32
  }
  func.func @transform_5(%arg0: i32, %arg1: i32, %arg2: memref<1xi32, #tpu.memory_space<smem>>) -> (i32, i32) {
    %c0_i32 = arith.constant 0 : i32
    %c0_i32_0 = arith.constant 0 : i32
    return %arg0, %c0_i32 : i32, i32
  }
}

</mosaic_0001>

<bundles_post_ra>
// kernel: tpu_custom_call.1
= control target key start
LH: loop header
LB: loop body
LE: loop exit
PB: predicated region body
PF: predicated region fallthrough
CT: control target
= control target key end

     0   :  { %12 = vsyncpa [#allocation5], 0  ;;  %s2345_s0 = inlined_call_operand.<no memory space> [shape: s32[1], index: 0, kind: input, shape index: {}]   ;;  %s2346_s1 = inlined_call_operand.hbm [shape: bf16[8,768], index: 1, kind: input, shape index: {}]   ;;  %s2347_s2 = inlined_call_operand.hbm [shape: f32[1,768], index: 2, kind: input, shape index: {}]   ;;  %s2348_s3 = inlined_call_operand.hbm [shape: f32[1,768], index: 3, kind: input, shape index: {}]   ;;  %s2349_s4 = inlined_call_operand.hbm [shape: bf16[768,128], index: 4, kind: input, shape index: {}]   ;;  %s2350_s5 = inlined_call_operand.vmem [shape: f32[1,128], index: 5, kind: input, shape index: {}]   ;;  %s2351_s6 = inlined_call_operand.hbm [shape: f32[8,128], index: 6, kind: output, shape index: {}]  }
   0x1   :  { %13 = vsyncpa [#allocation8], 0 }
   0x2   :  { %14 = vsyncpa [#allocation11], 0 }
   0x3   :  { %15 = vsyncpa [#allocation6], 0  ;;  %s1921_s21 = smov [#allocation7]   ;;  %s1922_s23 = smov [#allocation4]  }
   0x4   :  { %s32_s22 = sshll.u32 %s1921_s21, 4  ;;  %s22_s24 = sshll.u32 %s1922_s23, 4  ;;  %s33_s22 = int_to_ptr.vmem [resolvable:$true] %s32_s22  ;;  %s23_s24 = int_to_ptr.vmem [resolvable:$true] %s22_s24 }
   0x5   :  { %s1821_s25 = scalar_lea.vmem %s33_s22, 96  ;;  %p1826_p1 = scmp.lt.s32.totalorder %s33_s22, %s33_s22 }
   0x6   :  { %p1822_p0 = scmp.ne.s32.totalorder %s33_s22, %s1821_s25  ;;  %p1827_p2 = scmp.lt.s32.totalorder %s1821_s25, %s1821_s25 }
   0x8   :  { %p1828_p3 = por %p1827_p2, %p1826_p1 }
   0xa   :  { %p1829_p4 = pnand %p1828_p3, %p1822_p0 }
   0xc   :  { %1832 = shalt.err (!%p1829_p4)
}
   0xd   :  { %35 = dma.hbm_to_vmem [thread:$0]  %s2347_s2, 96, %s33_s22, [#allocation8]  }
   0xe   :  { %s1841_s28 = scalar_lea.vmem %s23_s24, 384  ;;  %p1846_p6 = scmp.lt.s32.totalorder %s23_s24, %s23_s24 }
   0xf   :  { %p1842_p5 = scmp.ne.s32.totalorder %s23_s24, %s1841_s28  ;;  %p1847_p7 = scmp.lt.s32.totalorder %s1841_s28, %s1841_s28 }
  0x11   :  { %p1848_p8 = por %p1847_p7, %p1846_p6 }
  0x13   :  { %p1849_p9 = pnand %p1848_p8, %p1842_p5 }
  0x15   :  { %1852 = shalt.err (!%p1849_p9)
}
  0x16   :  { %25 = dma.hbm_to_vmem [thread:$0]  %s2346_s1, 384, %s23_s24, [#allocation5]  }
  0x17   :  { %s1923_s7 = smov [#allocation9]   ;;  %s1924_s9 = smov [#allocation10]  }
  0x18   :  { %s42_s8 = sshll.u32 %s1923_s7, 4  ;;  %s51_s10 = sshll.u32 %s1924_s9, 4  ;;  %s43_s8 = int_to_ptr.vmem [resolvable:$true] %s42_s8  ;;  %s52_s10 = int_to_ptr.vmem [resolvable:$true] %s51_s10 }
  0x19   :  { %s1861_s11 = scalar_lea.vmem %s43_s8, 96  ;;  %p1866_p11 = scmp.lt.s32.totalorder %s43_s8, %s43_s8 }
  0x1a   :  { %p1862_p10 = scmp.ne.s32.totalorder %s43_s8, %s1861_s11  ;;  %p1867_p12 = scmp.lt.s32.totalorder %s1861_s11, %s1861_s11 }
  0x1c   :  { %p1868_p13 = por %p1867_p12, %p1866_p11 }
  0x1e   :  { %p1869_p0 = pnand %p1868_p13, %p1862_p10 }
  0x20   :  { %1872 = shalt.err (!%p1869_p0)
}
  0x21   :  { %45 = dma.hbm_to_vmem [thread:$0]  %s2348_s3, 96, %s43_s8, [#allocation8]  }
  0x22   :  { %s1881_s13 = scalar_lea.vmem %s52_s10, 6144  ;;  %p1886_p2 = scmp.lt.s32.totalorder %s52_s10, %s52_s10 }
  0x23   :  { %p1882_p1 = scmp.ne.s32.totalorder %s52_s10, %s1881_s13  ;;  %p1887_p3 = scmp.lt.s32.totalorder %s1881_s13, %s1881_s13 }
  0x25   :  { %p1888_p4 = por %p1887_p3, %p1886_p2 }
  0x27   :  { %p1889_p5 = pnand %p1888_p4, %p1882_p1 }
  0x29   :  { %1892 = shalt.err (!%p1889_p5)
}
  0x2a   :  { %s1925_s1 = smov 64   ;;  %s1926_s14 = smov 4  }
  0x2b   :  { %57 = dma.hbm_to_vmem [thread:$0]  %s2349_s4, 6144, %s52_s10, [#allocation11], %s1925_s1, %s1925_s1, %s1926_s14  }
  0x2c   :  { %1913 = dma.done.wait [#allocation5], 384  }
  0x2d   :  { %1914 = vsyncadd [#allocation5], 4294966912 }
  0x2e   :  { %1915 = dma.done.wait [#allocation8], 192  }
  0x2f   :  { %1916 = vsyncadd [#allocation8], 4294967104 }
  0x30   :  { %1917 = dma.done.wait [#allocation11], 6144  }
  0x31   :  { %1918 = vsyncadd [#allocation11], 4294961152  ;;  %v78_v0 = vlaneseq  ;;  %v1927_v1 = vmov 0.0   ;;  %v1741_v8 = vld [vmem:[#allocation10 + $0x138] sm:$0xff]   ;;  %v1744_v11 = vld [vmem:[#allocation10 + $0x130] sm:$0xff]   ;;  %vm1928_vm0 = vmmov 0   ;;  %v112_v39 = vstv %s2345_s0 }
  0x32   :  { %1674 = vmatprep.subr.bf16.mxu1 %v1927_v1  ;;  %v1742_v9 = vld [vmem:[#allocation10 + $0xf8] sm:$0xff]   ;;  %1612 = vmatprep.subr.bf16.mxu0 %v1741_v8  ;;  %v1745_v12 = vld [vmem:[#allocation10 + $0xf0] sm:$0xff]   ;;  %v1747_v14 = vld [vmem:[#allocation10 + $0x128] sm:$0xff]   ;;  %s1935_s18 = smov [#allocation12]  }
  0x33   :  { %v1984_v2 = vshrl.u32 %v78_v0, 7  ;;  %v81_v3 = vand.u32 127, %v78_v0  ;;  %v1743_v10 = vld [vmem:[#allocation10 + $0x178] sm:$0xff]   ;;  %1613 = vmatpush3.bf16.msra.mxu0 %v1742_v9  ;;  %v1746_v13 = vld [vmem:[#allocation10 + $0x170] sm:$0xff]   ;;  %v1748_v15 = vld [vmem:[#allocation10 + $0xe8] sm:$0xff]   ;;  %1690 = vmatprep.mubr.msk.bf16.mxu1 %vm1928_vm0, %v1927_v1  ;;  %s1525_s19 = sshll.u32 %s1935_s18, 4  ;;  %s1526_s19 = int_to_ptr.vmem [resolvable:$true] %s1525_s19 }
  0x34   :  { %1675 = vmatpush3.bf16.msra.mxu1 %v1743_v10  ;;  %1614 = vmatprep.subr.bf16.mxu0 %v1744_v11  ;;  %v1749_v16 = vld [vmem:[#allocation10 + $0x168] sm:$0xff]   ;;  %v1750_v17 = vld [vmem:[#allocation10 + $0x120] sm:$0xff]   ;;  %v1753_v20 = vld [vmem:[#allocation10 + $0x118] sm:$0xff]   ;;  %s1893_s20 = scalar_lea.vmem %s1526_s19, 128  ;;  %p1898_p7 = scmp.lt.s32.totalorder %s1526_s19, %s1526_s19 }
  0x35   :  { %v83_v4 = vadd.s32 256, %v81_v3  ;;  %v1987_v5 = vmul.u32 768, %v1984_v2  ;;  %1676 = vmatprep.subr.bf16.mxu1 %v1927_v1  ;;  %v1751_v18 = vld [vmem:[#allocation10 + $0xe0] sm:$0xff]   ;;  %v1754_v21 = vld [vmem:[#allocation10 + $0xd8] sm:$0xff]   ;;  %v1756_v23 = vld [vmem:[#allocation10 + $0x110] sm:$0xff]   ;;  %v82_v24 = vadd.s32 128, %v81_v3  ;;  %p1894_p6 = scmp.ne.s32.totalorder %s1526_s19, %s1893_s20  ;;  %p1899_p8 = scmp.lt.s32.totalorder %s1893_s20, %s1893_s20 }
  0x36   :  { %v1752_v19 = vld [vmem:[#allocation10 + $0x160] sm:$0xff]   ;;  %v1755_v22 = vld [vmem:[#allocation10 + $0x158] sm:$0xff]   ;;  %v85_v25 = vadd.s32 512, %v81_v3  ;;  %v84_v26 = vadd.s32 384, %v81_v3  ;;  %v1757_v27 = vld [vmem:[#allocation10 + $0xd0] sm:$0xff]   ;;  %v86_v32 = vadd.s32 640, %v81_v3 }
  0x37   :  { %v1990_v6 = vadd.s32 %v1987_v5, %v81_v3  ;;  %v1993_v7 = vadd.s32 %v1987_v5, %v83_v4  ;;  %1615 = vmatpush3.bf16.msra.mxu0 %v1745_v12  ;;  %v1758_v28 = vld [vmem:[#allocation10 + $0x150] sm:$0xff]   ;;  %v1759_v29 = vld [vmem:[#allocation10 + $0x108] sm:$0xff]   ;;  %v100_v30 = vadd.s32 %v1987_v5, %v82_v24  ;;  %v1762_v36 = vld [vmem:[#allocation10 + $0x100] sm:$0xff]   ;;  %p1900_p9 = por %p1899_p8, %p1898_p7 }
  0x38   :  { %1677 = vmatpush3.bf16.msra.mxu1 %v1746_v13  ;;  %1616 = vmatprep.subr.bf16.mxu0 %v1747_v14  ;;  %v103_v31 = vadd.s32 %v1987_v5, %v85_v25  ;;  %v102_v33 = vadd.s32 %v1987_v5, %v84_v26  ;;  %v1760_v34 = vld [vmem:[#allocation10 + $0xc8] sm:$0xff]   ;;  %v1763_v40 = vld [vmem:[#allocation10 + $0xc0] sm:$0xff]   ;;  %v104_v42 = vadd.s32 %v1987_v5, %v86_v32  ;;  %v1765_v49 = vld [vmem:[#allocation10 + $0x78] sm:$0xff]  }
  0x39   :  { %1678 = vmatprep.subr.bf16.mxu1 %v1927_v1  ;;  %v1761_v35 = vld [vmem:[#allocation10 + $0x148] sm:$0xff]   ;;  %v105_v37 = vmul.u32 2654435769, %v1990_v6  ;;  %v106_v38 = vmul.u32 2654435769, %v100_v30  ;;  %v1764_v43 = vld [vmem:[#allocation10 + $0x140] sm:$0xff]   ;;  %p1901_p10 = pnand %p1900_p9, %p1894_p6 }
  0x3a   :  { %v109_v41 = vmul.u32 2654435769, %v103_v31  ;;  %v108_v45 = vmul.u32 2654435769, %v102_v33 }
  0x3b   :  { %1617 = vmatpush3.bf16.msra.mxu0 %v1748_v15  ;;  %v114_v44 = vadd.s32 %v112_v39, %v106_v38  ;;  %v113_v47 = vadd.s32 %v112_v39, %v105_v37  ;;  %v107_v51 = vmul.u32 2654435769, %v1993_v7  ;;  %v110_v54 = vmul.u32 2654435769, %v104_v42 }
  0x3c   :  { %1679 = vmatpush3.bf16.msra.mxu1 %v1749_v16  ;;  %1618 = vmatprep.subr.bf16.mxu0 %v1750_v17  ;;  %v117_v46 = vadd.s32 %v112_v39, %v109_v41  ;;  %v116_v50 = vadd.s32 %v112_v39, %v108_v45 }
  0x3d   :  { %1680 = vmatprep.subr.bf16.mxu1 %v1927_v1  ;;  %v120_v48 = vshrl.u32 %v114_v44, 16  ;;  %v119_v53 = vshrl.u32 %v113_v47, 16  ;;  %v115_v57 = vadd.s32 %v112_v39, %v107_v51  ;;  %v118_v60 = vadd.s32 %v112_v39, %v110_v54 }
  0x3e   :  { %v123_v52 = vshrl.u32 %v117_v46, 16  ;;  %v122_v56 = vshrl.u32 %v116_v50, 16 }
  0x3f   :  { %1619 = vmatpush3.bf16.msra.mxu0 %v1751_v18  ;;  %v126_v55 = vxor.u32 %v120_v48, %v114_v44  ;;  %v125_v59 = vxor.u32 %v119_v53, %v113_v47  ;;  %v124_v3 = vshrl.u32 %v118_v60, 16 }
  0x40   :  { %1681 = vmatpush3.bf16.msra.mxu1 %v1752_v19  ;;  %1620 = vmatprep.subr.bf16.mxu0 %v1753_v20  ;;  %v129_v58 = vxor.u32 %v123_v52, %v117_v46  ;;  %v128_v62 = vxor.u32 %v122_v56, %v116_v50 }
  0x41   :  { %1682 = vmatprep.subr.bf16.mxu1 %v1927_v1  ;;  %v132_v61 = vmul.u32 569420461, %v126_v55  ;;  %v131_v0 = vmul.u32 569420461, %v125_v59  ;;  %v130_v7 = vxor.u32 %v124_v3, %v118_v60 }
  0x42   :  { %v135_v63 = vmul.u32 569420461, %v129_v58  ;;  %v134_v4 = vmul.u32 569420461, %v128_v62 }
  0x43   :  { %1621 = vmatpush3.bf16.msra.mxu0 %v1754_v21  ;;  %v138_v5 = vshrl.u32 %v132_v61, 15  ;;  %v137_v8 = vshrl.u32 %v131_v0, 15  ;;  %v136_v11 = vmul.u32 569420461, %v130_v7  ;;  %v121_v21 = vshrl.u32 %v115_v57, 16 }
  0x44   :  { %1683 = vmatpush3.bf16.msra.mxu1 %v1755_v22  ;;  %1622 = vmatprep.subr.bf16.mxu0 %v1756_v23  ;;  %v141_v6 = vshrl.u32 %v135_v63, 15  ;;  %v140_v9 = vshrl.u32 %v134_v4, 15  ;;  %v1929_v7 = vmov 683565275  }
  0x45   :  { %1684 = vmatprep.subr.bf16.mxu1 %v1927_v1  ;;  %v144_v13 = vxor.u32 %v138_v5, %v132_v61  ;;  %v142_v15 = vshrl.u32 %v136_v11, 15  ;;  %v143_v16 = vxor.u32 %v137_v8, %v131_v0  ;;  %v127_v30 = vxor.u32 %v121_v21, %v115_v57 }
  0x46   :  { %v147_v10 = vxor.u32 %v141_v6, %v135_v63  ;;  %v146_v12 = vxor.u32 %v140_v9, %v134_v4  ;;  %v1930_v9 = vmov 2475754826  }
  0x47   :  { %1623 = vmatpush3.bf16.msra.mxu0 %v1757_v27  ;;  %v148_v19 = vxor.u32 %v142_v15, %v136_v11  ;;  %v150_v22 = vmul.u32 1935289751, %v144_v13  ;;  %v149_v24 = vmul.u32 1935289751, %v143_v16  ;;  %v1931_v11 = vmov 2131351028  }
  0x48   :  { %1685 = vmatpush3.bf16.msra.mxu1 %v1758_v28  ;;  %1624 = vmatprep.subr.bf16.mxu0 %v1759_v29  ;;  %v153_v14 = vmul.u32 1935289751, %v147_v10  ;;  %v152_v17 = vmul.u32 1935289751, %v146_v12 }
  0x49   :  { %1686 = vmatprep.subr.bf16.mxu1 %v1927_v1  ;;  %v154_v27 = vmul.u32 1935289751, %v148_v19  ;;  %v156_v31 = vshrl.u32 %v150_v22, 15  ;;  %v155_v32 = vshrl.u32 %v149_v24, 15  ;;  %v133_v38 = vmul.u32 569420461, %v127_v30 }
  0x4a   :  { %v159_v18 = vshrl.u32 %v153_v14, 15  ;;  %v158_v20 = vshrl.u32 %v152_v17, 15 }
  0x4b   :  { %1625 = vmatpush3.bf16.msra.mxu0 %v1760_v34  ;;  %v162_v39 = vxor.u32 %v156_v31, %v150_v22  ;;  %v139_v46 = vshrl.u32 %v133_v38, 15  ;;  %v1933_v22 = vmov 920167782  }
  0x4c   :  { %1687 = vmatpush3.bf16.msra.mxu1 %v1761_v35  ;;  %1626 = vmatprep.subr.bf16.mxu0 %v1762_v36  ;;  %v165_v23 = vxor.u32 %v159_v18, %v153_v14  ;;  %v164_v25 = vxor.u32 %v158_v20, %v152_v17  ;;  %v160_v36 = vshrl.u32 %v154_v27, 15  ;;  %v1932_v18 = vmov 2102212464  }
  0x4d   :  { %1688 = vmatprep.subr.bf16.mxu1 %v1927_v1  ;;  %v168_v47 = vshrl.u32 %v162_v39, 9  ;;  %v2021_v55 = vxor.u32 %v139_v46, %v133_v38 }
  0x4e   :  { %v171_v26 = vshrl.u32 %v165_v23, 9  ;;  %v170_v28 = vshrl.u32 %v164_v25, 9  ;;  %v166_v44 = vxor.u32 %v160_v36, %v154_v27 }
  0x4f   :  { %1627 = vmatpush3.bf16.msra.mxu0 %v1763_v40  ;;  %v161_v40 = vxor.u32 %v155_v32, %v149_v24  ;;  %v174_v56 = vor.u32 1065353216, %v168_v47  ;;  %v151_v63 = vmul.u32 1935289751, %v2021_v55 }
  0x50   :  { %1689 = vmatpush3.bf16.msra.mxu1 %v1764_v43  ;;  %1643 = vmatprep.subr.bf16.mxu0 %v1765_v49  ;;  %v177_v29 = vor.u32 1065353216, %v171_v26  ;;  %v176_v33 = vor.u32 1065353216, %v170_v28  ;;  %v172_v53 = vshrl.u32 %v166_v44, 9 }
  0x51   :  { %1694 = vmatprep.subr.bf16.mxu1 %v1927_v1  ;;  %v167_v48 = vshrl.u32 %v161_v40, 9  ;;  %v186_v0 = vsub.f32 2.0, %v174_v56 }
  0x52   :  { %v1537_v34 = vadd.f32 -1.0, %v177_v29  ;;  %v1536_v35 = vadd.f32 -1.0, %v176_v33  ;;  %v178_v61 = vor.u32 1065353216, %v172_v53  ;;  %v1934_v29 = vmov 1326507024  }
  0x53   :  { %v2023_v57 = vor.u32 1065353216, %v167_v48  ;;  %1789 = vlog2.f32 %v186_v0 }
  0x54   :  { %v2014_v37 = vmul.f32 6.2831855, %v1537_v34  ;;  %v2016_v41 = vmul.f32 6.2831855, %v1536_v35  ;;  %v1538_v15 = vadd.f32 -1.0, %v178_v61 }
  0x55   :  { %v185_v4 = vsub.f32 2.0, %v2023_v57  ;;  %v157_v57 = vshrl.u32 %v151_v63, 15 }
  0x56   :  { %v330_v42 = vand.u32 2139095040, %v2014_v37  ;;  %v227_v43 = vand.u32 2139095040, %v2016_v41  ;;  %v327_v50 = vand.u32 2147483647, %v2014_v37  ;;  %v224_v14 = vand.u32 2147483647, %v2016_v41 }
  0x57   :  { %v2049_v44 = vmul.f32 6.2831855, %v1538_v15  ;;  %1791 = vlog2.f32 %v185_v4  ;;  %vm329_vm14 = vcmp.lt.s32.totalorder %v2014_v37, 0 }
  0x58   :  { %v331_v45 = vshrl.u32 %v330_v42, 23  ;;  %v228_v49 = vshrl.u32 %v227_v43, 23  ;;  %v334_v59 = vand.u32 8388607, %v327_v50  ;;  %v231_v32 = vand.u32 8388607, %v224_v14 }
  0x5a   :  { %v1543_v51 = vadd.s32 4294967169, %v331_v45  ;;  %v1539_v52 = vadd.s32 4294967169, %v228_v49  ;;  %v335_v13 = vor.u32 8388608, %v334_v59 }
  0x5c   :  { %v337_v54 = vadd.s32 1, %v1543_v51  ;;  %v234_v58 = vadd.s32 1, %v1539_v52  ;;  %v375_v31 = vshll.u32 %v335_v13, 8 }
  0x5e   :  { %vm338_vm1 = vcmp.gt.s32.totalorder %v337_v54, 0  ;;  %vm235_vm2 = vcmp.gt.s32.totalorder %v234_v58, 0 }
  0x5f   :  { %v339_v60 = vsel %vm338_vm1, %v337_v54, 0  ;;  %v236_v5 = vsel %vm235_vm2, %v234_v58, 0  ;;  %v232_v58 = vor.u32 8388608, %v231_v32  ;;  %vm2138_vm1 = vcmp.le.f32.partialorder %v327_v50, 0.7853982 }
  0x60   :  { %v341_v62 = vand.u32 31, %v339_v60  ;;  %v340_v3 = vshrl.u32 %v339_v60, 5  ;;  %v238_v24 = vand.u32 31, %v236_v5  ;;  %v237_v61 = vshrl.u32 %v236_v5, 5 }
  0x62   :  { %v342_v6 = vsub.s32 32, %v341_v62  ;;  %v344_v8 = vshll.u32 %v1929_v7, %v341_v62  ;;  %v347_v10 = vshll.u32 %v1930_v9, %v341_v62  ;;  %v350_v12 = vshll.u32 %v1931_v11, %v341_v62 }
  0x63   :  { %v353_v20 = vshll.u32 %v1932_v18, %v341_v62  ;;  %v356_v23 = vshll.u32 %v1933_v22, %v341_v62  ;;  %vm359_vm3 = vcmp.lt.s32.totalorder %v340_v3, 1  ;;  %vm362_vm4 = vcmp.lt.s32.totalorder %v340_v3, 4 }
  0x64   :  { %v345_v16 = vshrl.u32 %v1930_v9, %v342_v6  ;;  %v348_v17 = vshrl.u32 %v1931_v11, %v342_v6  ;;  %v351_v19 = vshrl.u32 %v1932_v18, %v342_v6  ;;  %v343_v21 = vshrl.u32 %v1929_v7, %v342_v6 }
  0x65   :  { %v354_v28 = vshrl.u32 %v1933_v22, %v342_v6  ;;  %v357_v30 = vshrl.u32 %v1934_v29, %v342_v6  ;;  %vm360_vm5 = vcmp.lt.s32.totalorder %v340_v3, 2  ;;  %vm361_vm6 = vcmp.lt.s32.totalorder %v340_v3, 3 }
  0x66   :  { %v346_v25 = vor.u32 %v345_v16, %v344_v8  ;;  %v349_v26 = vor.u32 %v348_v17, %v347_v10  ;;  %v352_v27 = vor.u32 %v351_v19, %v350_v12  ;;  %v239_v43 = vsub.s32 32, %v238_v24 }
  0x67   :  { %v355_v33 = vor.u32 %v354_v28, %v353_v20  ;;  %v358_v35 = vor.u32 %v357_v30, %v356_v23  ;;  %v241_v47 = vshll.u32 %v1929_v7, %v238_v24  ;;  %v433_v62 = vand.u32 2139095040, %v2049_v44 }
  0x68   :  { %v364_v34 = vsel %vm362_vm4, %v352_v27, 2102212464  ;;  %v363_v36 = vsel %vm359_vm3, %v343_v21, %v346_v25  ;;  %v367_v39 = vsel %vm359_vm3, %v346_v25, %v349_v26  ;;  %v371_v42 = vsel %vm359_vm3, %v349_v26, %v352_v27 }
  0x69   :  { %v365_v38 = vsel %vm361_vm6, %v349_v26, %v364_v34  ;;  %v368_v40 = vsel %vm362_vm4, %v355_v33, 920167782  ;;  %v372_v46 = vsel %vm362_vm4, %v358_v35, 1326507024  ;;  %v242_v52 = vshrl.u32 %v1930_v9, %v239_v43 }
  0x6a   :  { %v369_v45 = vsel %vm361_vm6, %v352_v27, %v368_v40  ;;  %v366_v48 = vsel %vm360_vm5, %v363_v36, %v365_v38  ;;  %v373_v51 = vsel %vm361_vm6, %v355_v33, %v372_v46  ;;  %v244_v8 = vshll.u32 %v1930_v9, %v238_v24  ;;  %v1790_v38 = vpop.eup %1789 }
  0x6b   :  { %v370_v49 = vsel %vm360_vm5, %v367_v39, %v369_v45  ;;  %v374_v53 = vsel %vm360_vm5, %v371_v42, %v373_v51  ;;  %v382_v0 = vmul.u32 %v375_v31, %v366_v48  ;;  %v243_v6 = vor.u32 %v242_v52, %v241_v47 }
  0x6c   :  { %v2059_v54 = vmul.u32.u64.low %v375_v31, %v370_v49  ;;  %v2060_v56 = vmul.u32.u64.high %v375_v31, %v370_v49, %v2059_v54  ;;  %v2063_v59 = vmul.u32.u64.low %v375_v31, %v374_v53  ;;  %v2064_v60 = vmul.u32.u64.high %v375_v31, %v374_v53, %v2063_v59 }
  0x6d   :  { %v245_v10 = vshrl.u32 %v1931_v11, %v239_v43  ;;  %v247_v3 = vshll.u32 %v1931_v11, %v238_v24  ;;  %v248_v12 = vshrl.u32 %v1932_v18, %v239_v43  ;;  %v250_v13 = vshll.u32 %v1932_v18, %v238_v24 }
  0x6e   :  { %v251_v15 = vshrl.u32 %v1933_v22, %v239_v43  ;;  %v385_v16 = vadd.s32 1, %v2060_v56  ;;  %v253_v5 = vshll.u32 %v1933_v22, %v238_v24  ;;  %v254_v19 = vshrl.u32 %v1934_v29, %v239_v43 }
  0x6f   :  { %v246_v17 = vor.u32 %v245_v10, %v244_v8  ;;  %vm384_vm7 = vc.u32 %v2064_v60, %v2059_v54  ;;  %v240_v20 = vshrl.u32 %v1929_v7, %v239_v43  ;;  %v249_v25 = vor.u32 %v248_v12, %v247_v3  ;;  %v1792_v8 = vpop.eup %1791 }
  0x70   :  { %v252_v21 = vor.u32 %v251_v15, %v250_v13  ;;  %v386_v23 = vsel %vm384_vm7, %v385_v16, %v2060_v56  ;;  %v255_v26 = vor.u32 %v254_v19, %v253_v5  ;;  %vm256_vm8 = vcmp.lt.s32.totalorder %v237_v61, 1 }
  0x71   :  { %v387_v27 = vadd.s32 %v386_v23, %v382_v0  ;;  %vm258_vm9 = vcmp.lt.s32.totalorder %v237_v61, 3  ;;  %vm259_vm10 = vcmp.lt.s32.totalorder %v237_v61, 4  ;;  %v272_v24 = vshll.u32 %v232_v58, 8 }
  0x72   :  { %vm257_vm11 = vcmp.lt.s32.totalorder %v237_v61, 2  ;;  %v261_v28 = vsel %vm259_vm10, %v249_v25, 2102212464  ;;  %v264_v30 = vsel %vm256_vm8, %v243_v6, %v246_v17  ;;  %v434_v31 = vshrl.u32 %v433_v62, 23 }
  0x73   :  { %v388_v32 = vadd.s32 536870912, %v387_v27  ;;  %v265_v33 = vsel %vm259_vm10, %v252_v21, 920167782  ;;  %v260_v4 = vsel %vm256_vm8, %v240_v20, %v243_v6  ;;  %v268_v35 = vsel %vm256_vm8, %v246_v17, %v249_v25 }
  0x74   :  { %v266_v34 = vsel %vm258_vm9, %v249_v25, %v265_v33  ;;  %v269_v36 = vsel %vm259_vm10, %v255_v26, 1326507024  ;;  %v262_v40 = vsel %vm258_vm9, %v246_v17, %v261_v28  ;;  %v1547_v48 = vadd.s32 4294967169, %v434_v31 }
  0x75   :  { %v2085_v39 = vshrl.u32 %v388_v32, 30  ;;  %v267_v42 = vsel %vm257_vm11, %v264_v30, %v266_v34  ;;  %v270_v43 = vsel %vm258_vm9, %v252_v21, %v269_v36  ;;  %v263_v53 = vsel %vm257_vm11, %v260_v4, %v262_v40 }
  0x76   :  { %v271_v45 = vsel %vm257_vm11, %v268_v35, %v270_v43  ;;  %v2091_v46 = vmul.u32.u64.low %v272_v24, %v267_v42  ;;  %v2092_v47 = vmul.u32.u64.high %v272_v24, %v267_v42, %v2091_v46  ;;  %v163_v59 = vxor.u32 %v157_v57, %v151_v63 }
  0x77   :  { %v390_v49 = vshll.u32 %v2085_v39, 30  ;;  %v2096_v51 = vmul.u32.u64.low %v272_v24, %v271_v45  ;;  %v2097_v52 = vmul.u32.u64.high %v272_v24, %v271_v45, %v2096_v51  ;;  %v440_v62 = vadd.s32 1, %v1547_v48 }
  0x78   :  { %v282_v58 = vadd.s32 1, %v2092_v47  ;;  %v279_v6 = vmul.u32 %v272_v24, %v263_v53  ;;  %v430_v10 = vand.u32 2147483647, %v2049_v44  ;;  %v169_v61 = vshrl.u32 %v163_v59, 9 }
  0x79   :  { %v391_v56 = vsub.s32 %v387_v27, %v390_v49  ;;  %vm281_vm12 = vc.u32 %v2097_v52, %v2091_v46  ;;  %vm441_vm13 = vcmp.gt.s32.totalorder %v440_v62, 0  ;;  %v197_v17 = vmul.f32 0.6931472, %v1790_v38 }
  0x7a   :  { %v283_v12 = vsel %vm281_vm12, %v282_v58, %v2092_v47  ;;  %v442_v16 = vsel %vm441_vm13, %v440_v62, 0  ;;  %v437_v55 = vand.u32 8388607, %v430_v10  ;;  %v2110_v20 = vsub.s32 1, %v1984_v2 }
  0x7b   :  { %v393_v0 = vsub.s32 0, %v391_v56  ;;  %v284_v15 = vadd.s32 %v283_v12, %v279_v6  ;;  %v444_v19 = vand.u32 31, %v442_v16  ;;  %v195_v21 = vmul.f32 0.6931472, %v1792_v8 }
  0x7c   :  { %v2112_v23 = vor.u32 1065353216, %v169_v61  ;;  %v383_v25 = vadd.s32 %v2059_v54, %v2064_v60  ;;  %v2119_v27 = vmul.f32 -2.0, %v197_v17  ;;  %v438_v28 = vor.u32 8388608, %v437_v55 }
  0x7d   :  { %v1544_v3 = vmin.u32 %v393_v0, %v391_v56  ;;  %v285_v5 = vadd.s32 536870912, %v284_v15  ;;  %v445_v30 = vsub.s32 32, %v444_v19  ;;  %v413_v4 = vsub.s32 4, %v2085_v39 }
  0x7e   :  { %v2123_v34 = vmul.f32 -2.0, %v195_v21  ;;  %v2125_v35 = vshrl.u32 %v442_v16, 5  ;;  %v447_v54 = vshll.u32 %v1929_v7, %v444_v19  ;;  %v450_v40 = vshll.u32 %v1930_v9, %v444_v19 }
  0x7f   :  { %v395_v13 = vclz %v1544_v3  ;;  %v2117_v26 = vshrl.u32 %v285_v5, 30  ;;  %v448_v42 = vshrl.u32 %v1930_v9, %v445_v30  ;;  %v451_v43 = vshrl.u32 %v1931_v11, %v445_v30 }
  0x80   :  { %v453_v45 = vshll.u32 %v1931_v11, %v444_v19  ;;  %v454_v47 = vshrl.u32 %v1932_v18, %v445_v30  ;;  %1793 = vrsqrt.f32 %v2119_v27  ;;  %v414_v9 = vsel %vm329_vm14, %v413_v4, %v2085_v39 }
  0x81   :  { %v1545_v63 = vadd.s32 4294967294, %v395_v13  ;;  %v287_v57 = vshll.u32 %v2117_v26, 30  ;;  %1795 = vrsqrt.f32 %v2123_v34  ;;  %vm462_vm2 = vcmp.lt.s32.totalorder %v2125_v35, 1 }
  0x82   :  { %v2148_v11 = vshll.u32 %v438_v28, 8  ;;  %v456_v59 = vshll.u32 %v1932_v18, %v444_v19  ;;  %v446_v62 = vshrl.u32 %v1929_v7, %v445_v30  ;;  %v449_v0 = vor.u32 %v448_v42, %v447_v54 }
  0x83   :  { %vm1546_vm15 = vcmp.lt.s32.totalorder %v1545_v63, 0  ;;  %v2128_v38 = vsub.s32 %v284_v15, %v287_v57  ;;  %v452_v6 = vor.u32 %v451_v43, %v450_v40  ;;  %v455_v8 = vor.u32 %v454_v47, %v453_v45 }
  0x84   :  { %v398_v24 = vsel %vm1546_vm15, 0, %v1545_v63  ;;  %v457_v39 = vshrl.u32 %v1933_v22, %v445_v30  ;;  %v459_v61 = vshll.u32 %v1933_v22, %v444_v19  ;;  %v280_v13 = vadd.s32 %v2091_v46, %v2097_v52 }
  0x85   :  { %v399_v31 = vsub.s32 32, %v398_v24  ;;  %v400_v32 = vshll.u32 %v391_v56, %v398_v24  ;;  %v403_v33 = vsub.s32 4294967266, %v398_v24  ;;  %v290_v53 = vsub.s32 0, %v2128_v38 }
  0x86   :  { %v460_v15 = vshrl.u32 %v1934_v29, %v445_v30  ;;  %vm463_vm3 = vcmp.lt.s32.totalorder %v2125_v35, 2  ;;  %vm465_vm4 = vcmp.lt.s32.totalorder %v2125_v35, 4  ;;  %v458_v16 = vor.u32 %v457_v39, %v456_v59 }
  0x87   :  { %v401_v60 = vshrl.u32 %v383_v25, %v399_v31  ;;  %v404_v36 = vadd.s32 127, %v403_v33  ;;  %v1540_v50 = vmin.u32 %v290_v53, %v2128_v38  ;;  %vm464_vm5 = vcmp.lt.s32.totalorder %v2125_v35, 3  ;;  %v2202_v53 = vld [vmem:[#allocation4 + $0xc] sm:$0xff]  ;;  %v2207_v35 = vld [vmem:[#allocation9 + $0x3] sm:$0x7] }
  0x88   :  { %v461_v17 = vor.u32 %v460_v15, %v459_v61  ;;  %v466_v55 = vsel %vm462_vm2, %v446_v62, %v449_v0  ;;  %v467_v22 = vsel %vm465_vm4, %v455_v8, 2102212464  ;;  %v470_v46 = vsel %vm462_vm2, %v449_v0, %v452_v6 }
  0x89   :  { %v402_v49 = vor.u32 %v401_v60, %v400_v32  ;;  %v405_v51 = vshll.u32 %v404_v36, 23  ;;  %v292_v12 = vclz %v1540_v50  ;;  %v471_v52 = vsel %vm465_vm4, %v458_v16, 920167782 }
  0x8a   :  { %v474_v63 = vsel %vm462_vm2, %v452_v6, %v455_v8  ;;  %v468_v19 = vsel %vm464_vm5, %v452_v6, %v467_v22  ;;  %v472_v21 = vsel %vm464_vm5, %v455_v8, %v471_v52  ;;  %v475_v25 = vsel %vm465_vm4, %v461_v17, 1326507024 }
  0x8b   :  { %v406_v56 = vor.u32 4788187, %v405_v51  ;;  %v409_v58 = vcvt.s32.f32 %v402_v49  ;;  %v1541_v7 = vadd.s32 4294967294, %v292_v12  ;;  %v416_v33 = vsel %vm2138_vm1, 0, %v414_v9  ;;  %v2204_v9 = vld [vmem:[#allocation7 + $0x3] sm:$0x7] }
  0x8c   :  { %v473_v57 = vsel %vm463_vm3, %v470_v46, %v472_v21  ;;  %v476_v4 = vsel %vm464_vm5, %v458_v16, %v475_v25  ;;  %v469_v40 = vsel %vm463_vm3, %v466_v55, %v468_v19  ;;  %v733_v59 = vadd.s32 3, %v416_v33 }
  0x8d   :  { %v407_v3 = vand.u32 2147483647, %v406_v56  ;;  %vm1542_vm6 = vcmp.lt.s32.totalorder %v1541_v7, 0  ;;  %v477_v36 = vsel %vm463_vm3, %v474_v63, %v476_v4  ;;  %v187_v56 = vsub.f32 2.0, %v2112_v23 }
  0x8e   :  { %v295_v5 = vsel %vm1542_vm6, 0, %v1541_v7  ;;  %v2194_v42 = vmul.u32.u64.low %v2148_v11, %v477_v36  ;;  %v2195_v43 = vmul.u32.u64.high %v2148_v11, %v477_v36, %v2194_v42  ;;  %v2210_v62 = vsub.s32 0, %v1984_v2 }
  0x8f   :  { %v410_v18 = vmul.f32 %v409_v58, %v407_v3  ;;  %v296_v28 = vsub.s32 32, %v295_v5  ;;  %v297_v30 = vshll.u32 %v2128_v38, %v295_v5  ;;  %v300_v31 = vsub.s32 4294967266, %v295_v5  ;;  %v1794_v38 = vpop.eup %1793 }
  0x90   :  { %v1796_v45 = vpop.eup %1795  ;;  %v2198_v49 = vmul.u32.u64.low %v2148_v11, %v473_v57  ;;  %v2199_v51 = vmul.u32.u64.high %v2148_v11, %v473_v57, %v2198_v49  ;;  %v485_v0 = vmul.u32 %v2148_v11, %v469_v40  ;;  %v859_v6 = vunpack.c.h.bf16 %v2202_v53  ;;  %v2255_v40 = vld [vmem:[#allocation7] sm:$0x7] }
  0x91   :  { %v411_v29 = vxor.u32 2147483648, %v410_v18  ;;  %v298_v54 = vshrl.u32 %v280_v13, %v296_v28  ;;  %v301_v60 = vadd.s32 127, %v300_v31  ;;  %v916_v8 = vrot.slane %v2204_v9, %v2110_v20 }
  0x92   :  { %vm487_vm7 = vc.u32 %v2195_v43, %v2198_v49  ;;  %v488_v23 = vadd.s32 1, %v2199_v51  ;;  %v211_v12 = vmul.f32 %v1794_v38, %v2119_v27  ;;  %v858_v39 = vunpack.c.l.bf16 %v2202_v53  ;;  %v851_v38 = vld [vmem:[#allocation4] sm:$0xff] }
  0x93   :  { %v412_v24 = vsel %vm329_vm14, %v411_v29, %v410_v18  ;;  %v299_v47 = vor.u32 %v298_v54, %v297_v30  ;;  %v302_v48 = vshll.u32 %v301_v60, 23  ;;  %v936_v61 = vrot.slane %v2207_v35, %v2110_v20 }
  0x94   :  { %v415_v32 = vsel %vm2138_vm1, %v2014_v37, %v412_v24  ;;  %v420_v11 = vand.u32 3, %v416_v33  ;;  %v310_v15 = vsub.s32 4, %v2117_v26  ;;  %v489_v18 = vsel %vm487_vm7, %v488_v23, %v2199_v51 }
  0x95   :  { %1797 = vcosq.f32 %v415_v32  ;;  %v303_v58 = vor.u32 4788187, %v302_v48  ;;  %v306_v50 = vcvt.s32.f32 %v299_v47  ;;  %vm212_vm8 = vcmp.eq.f32.partialorder %v2119_v27, inf }
  0x96   :  { %1799 = vsinq.f32 %v415_v32  ;;  %v734_v7 = vand.u32 3, %v733_v59  ;;  %vm226_vm9 = vcmp.lt.s32.totalorder %v2016_v41, 0  ;;  %v490_v16 = vadd.s32 %v489_v18, %v485_v0 }
  0x97   :  { %v304_v3 = vand.u32 2147483647, %v303_v58  ;;  %1801 = vlog2.f32 %v187_v56  ;;  %v925_v17 = vmul.f32 %v916_v8, %v859_v6  ;;  %vm2229_vm10 = vcmp.le.f32.partialorder %v224_v14, 0.7853982 }
  0x98   :  { %v912_v46 = vrot.slane %v2204_v9, %v2210_v62  ;;  %vm214_vm11 = vcmp.eq.f32.partialorder %v2119_v27, 0.0  ;;  %v215_v29 = vand.u32 2147483648, %v2119_v27  ;;  %vm419_vm12 = vweird.f32 %v2014_v37 }
  0x99   :  { %v307_v13 = vmul.f32 %v306_v50, %v304_v3  ;;  %v491_v52 = vadd.s32 536870912, %v490_v16  ;;  %v213_v63 = vsel %vm212_vm8, %v2119_v27, %v211_v12  ;;  %vm422_vm13 = vcmp.eq.s32.totalorder %v420_v11, 0  ;;  %v2271_v12 = vld [vmem:[#allocation9] sm:$0x7] }
  0x9a   :  { %v311_v14 = vsel %vm226_vm9, %v310_v15, %v2117_v26  ;;  %vm425_vm14 = vcmp.eq.s32.totalorder %v420_v11, 2  ;;  %vm739_vm15 = vcmp.eq.s32.totalorder %v734_v7, 2  ;;  %vm735_vm1 = vcmp.lt.s32.totalorder %v734_v7, 2 }
  0x9b   :  { %v308_v22 = vxor.u32 2147483648, %v307_v13  ;;  %v2243_v25 = vshrl.u32 %v491_v52, 30  ;;  %vm736_vm2 = vcmp.eq.s32.totalorder %v734_v7, 0  ;;  %v313_v31 = vsel %vm2229_vm10, 0, %v311_v14 }
  0x9c   :  { %v216_v32 = vsel %vm214_vm11, %v215_v29, %v213_v63  ;;  %vm421_vm3 = vcmp.lt.s32.totalorder %v420_v11, 2  ;;  %v204_v57 = vmul.f32 %v1796_v45, %v2123_v34  ;;  %vm205_vm4 = vcmp.eq.f32.partialorder %v2123_v34, inf }
  0x9d   :  { %v309_v5 = vsel %vm226_vm9, %v308_v22, %v307_v13  ;;  %v493_v26 = vshll.u32 %v2243_v25, 30  ;;  %v629_v27 = vadd.s32 3, %v313_v31  ;;  %v932_v47 = vrot.slane %v2207_v35, %v2210_v62 }
  0x9e   :  { %v312_v21 = vsel %vm2229_vm10, %v2016_v41, %v309_v5  ;;  %v945_v48 = vadd.f32 %v936_v61, %v925_v17  ;;  %v208_v51 = vand.u32 2147483648, %v2123_v34  ;;  %v854_v0 = vunpack.c.h.bf16 %v851_v38 }
  0x9f   :  { %1803 = vcosq.f32 %v312_v21  ;;  %v2253_v36 = vsub.s32 %v490_v16, %v493_v26  ;;  %v870_v6 = vrot.slane %v2255_v40, %v2110_v20  ;;  %v206_v8 = vsel %vm205_vm4, %v2123_v34, %v204_v57 }
  0xa0   :  { %1805 = vsinq.f32 %v312_v21  ;;  %vm207_vm5 = vcmp.eq.f32.partialorder %v2123_v34, 0.0  ;;  %v317_v3 = vand.u32 3, %v313_v31  ;;  %vm316_vm6 = vweird.f32 %v2016_v41 }
  0xa1   :  { %v496_v56 = vsub.s32 0, %v2253_v36  ;;  %v630_v13 = vand.u32 3, %v629_v27  ;;  %v924_v11 = vmul.f32 %v912_v46, %v858_v39  ;;  %v853_v16 = vunpack.c.l.bf16 %v851_v38 }
  0xa2   :  { %v1798_v19 = vpop.eup %1797  ;;  %v209_v34 = vsel %vm207_vm5, %v208_v51, %v206_v8  ;;  %v879_v55 = vmul.f32 %v870_v6, %v854_v0  ;;  %v890_v22 = vrot.slane %v2271_v12, %v2110_v20  ;;  %vm318_vm7 = vcmp.lt.s32.totalorder %v317_v3, 2 }
  0xa3   :  { %v1800_v24 = vpop.eup %1799  ;;  %v426_v28 = vxor.u32 2147483648, %v1798_v19  ;;  %v1548_v23 = vmin.u32 %v496_v56, %v2253_v36  ;;  %vm319_vm8 = vcmp.eq.s32.totalorder %v317_v3, 0  ;;  %vm322_vm9 = vcmp.eq.s32.totalorder %v317_v3, 2 }
  0xa4   :  { %v423_v30 = vxor.u32 2147483648, %v1800_v24  ;;  %v1802_v58 = vpop.eup %1801  ;;  %vm631_vm10 = vcmp.lt.s32.totalorder %v630_v13, 2  ;;  %v866_v37 = vrot.slane %v2255_v40, %v2210_v62  ;;  %vm632_vm11 = vcmp.eq.s32.totalorder %v630_v13, 0 }
  0xa5   :  { %v741_v33 = vsel %vm739_vm15, %v426_v28, %v1800_v24  ;;  %v427_v54 = vsel %vm425_vm14, %v426_v28, %v1800_v24  ;;  %v199_v18 = vmul.f32 0.6931472, %v1802_v58  ;;  %v498_v7 = vclz %v1548_v23 }
  0xa6   :  { %v424_v4 = vsel %vm422_vm13, %v1798_v19, %v423_v30  ;;  %v738_v60 = vsel %vm736_vm2, %v1798_v19, %v423_v30  ;;  %v486_v39 = vadd.s32 %v2198_v49, %v2195_v43  ;;  %v899_v14 = vadd.f32 %v890_v22, %v879_v55  ;;  %v1771_v55 = vld [vmem:[#allocation10 + $0x68] sm:$0xff]  }
  0xa7   :  { %v742_v42 = vsel %vm735_vm1, %v738_v60, %v741_v33  ;;  %v428_v50 = vsel %vm421_vm3, %v424_v4, %v427_v54  ;;  %v1549_v29 = vadd.s32 4294967294, %v498_v7  ;;  %v886_v19 = vrot.slane %v2271_v12, %v2210_v62 }
  0xa8   :  { %v743_v45 = vsel %vm419_vm12, nan, %v742_v42  ;;  %v429_v15 = vsel %vm419_vm12, nan, %v428_v50  ;;  %vm635_vm12 = vcmp.eq.s32.totalorder %v630_v13, 2  ;;  %v878_v33 = vmul.f32 %v866_v37, %v853_v16  ;;  %v1766_v13 = vld [vmem:[#allocation10 + $0x38] sm:$0xff]   ;;  %v1769_v16 = vld [vmem:[#allocation10 + $0x30] sm:$0xff]  }
  0xa9   :  { %v849_v59 = vmul.f32 %v743_v45, %v216_v32  ;;  %v534_v52 = vmul.f32 %v429_v15, %v216_v32  ;;  %vm1550_vm13 = vcmp.lt.s32.totalorder %v1549_v29, 0  ;;  %v944_v51 = vadd.f32 %v932_v47, %v924_v11  ;;  %v1768_v47 = vld [vmem:[#allocation10 + $0x70] sm:$0xff]  }
  0xaa   :  { %v501_v5 = vsel %vm1550_vm13, 0, %v1549_v29  ;;  %v898_v56 = vadd.f32 %v886_v19, %v878_v33  ;;  %v2299_v58 = vmul.f32 -2.0, %v199_v18  ;;  %vm432_vm14 = vcmp.lt.s32.totalorder %v2049_v44, 0  ;;  %v1772_v29 = vld [vmem:[#allocation10 + $0x28] sm:$0xff]  }
  0xab   :  { %v948_v61 = vmul.f32 0.25, %v849_v59  ;;  %v502_v24 = vsub.s32 32, %v501_v5  ;;  %v503_v28 = vshll.u32 %v2253_v36, %v501_v5  ;;  %v506_v30 = vsub.s32 4294967266, %v501_v5 }
  0xac   :  { %v1804_v53 = vpop.eup %1803  ;;  %v902_v31 = vmul.f32 0.25, %v534_v52  ;;  %1807 = vrsqrt.f32 %v2299_v58  ;;  %v516_v62 = vsub.s32 4, %v2243_v25  ;;  %vm431_vm15 = vcmp.le.f32.partialorder %v430_v10, 0.7853982  ;;  %v1774_v52 = vld [vmem:[#allocation10 + $0x60] sm:$0xff]  }
  0xad   :  { %v951_v17 = vadd.f32 %v948_v61, %v945_v48  ;;  %v1806_v46 = vpop.eup %1805  ;;  %v323_v20 = vxor.u32 2147483648, %v1804_v53  ;;  %v504_v57 = vshrl.u32 %v486_v39, %v502_v24  ;;  %v507_v4 = vadd.s32 127, %v506_v30  ;;  %v1777_v39 = vld [vmem:[#allocation10 + $0x58] sm:$0xff]   ;;  %v1780_v24 = vld [vmem:[#allocation10 + $0x50] sm:$0xff]  }
  0xae   :  { %v320_v21 = vxor.u32 2147483648, %v1806_v46  ;;  %v905_v0 = vadd.f32 %v902_v31, %v899_v14  ;;  %v1778_v14 = vld [vmem:[#allocation10 + $0x18] sm:$0xff]   ;;  %vm219_vm1 = vcmp.eq.f32.partialorder %v2299_v58, inf  ;;  %vm522_vm2 = vweird.f32 %v2049_v44 }
  0xaf   :  { %v1054_v63 = vpack.c.bf16 %v951_v17, %v951_v17  ;;  %v324_v26 = vsel %vm322_vm9, %v323_v20, %v1806_v46  ;;  %v637_v32 = vsel %vm635_vm12, %v323_v20, %v1806_v46  ;;  %v505_v42 = vor.u32 %v504_v57, %v503_v28 }
  0xb0   :  { %v321_v43 = vsel %vm319_vm8, %v1804_v53, %v320_v21  ;;  %v634_v49 = vsel %vm632_vm11, %v1804_v53, %v320_v21  ;;  %v508_v27 = vshll.u32 %v507_v4, 23  ;;  %v1051_v15 = vpack.c.bf16 %v905_v0, %v905_v0 }
  0xb1   :  { %1232 = vmatprep.mubr.bf16.mxu0 %v1054_v63  ;;  %v325_v54 = vsel %vm318_vm7, %v321_v43, %v324_v26  ;;  %v638_v60 = vsel %vm631_vm10, %v634_v49, %v637_v32  ;;  %v512_v59 = vcvt.s32.f32 %v505_v42  ;;  %v517_v17 = vsel %vm432_vm14, %v516_v62, %v2243_v25  ;;  %v1775_v63 = vld [vmem:[#allocation10 + $0x20] sm:$0xff]   ;;  %v1781_v43 = vld [vmem:[#allocation10 + $0x10] sm:$0xff]   ;;  %v1773_v62 = vld [vmem:[#allocation10 + $0xa8] sm:$0xff]  }
  0xb2   :  { %v326_v38 = vsel %vm316_vm6, nan, %v325_v54  ;;  %v639_v36 = vsel %vm316_vm6, nan, %v638_v60  ;;  %v509_v50 = vor.u32 4788187, %v508_v27  ;;  %v519_v22 = vsel %vm431_vm15, 0, %v517_v17 }
  0xb3   :  { %v533_v45 = vmul.f32 %v326_v38, %v209_v34  ;;  %v848_v48 = vmul.f32 %v639_v36, %v209_v34  ;;  %v837_v10 = vadd.s32 3, %v519_v22  ;;  %v873_v53 = vsub.s32 2, %v1984_v2  ;;  %v857_v25 = vld [vmem:[#allocation4 + $0x8] ss:$12 sps:$4 sm:$0xff]  }
  0xb4   :  { %v510_v3 = vand.u32 2147483647, %v509_v50  ;;  %v523_v46 = vand.u32 3, %v519_v22  ;;  %v860_v19 = vunpack.c.h.bf16 %v857_v25  ;;  %v855_v28 = vunpack.c.l.bf16 %v857_v25  ;;  %v1786_v50 = vld [vmem:[#allocation10 + $0x40] sm:$0xff]  }
  0xb5   :  { %v901_v6 = vmul.f32 0.25, %v533_v45  ;;  %v947_v8 = vmul.f32 0.25, %v848_v48  ;;  %v838_v20 = vand.u32 3, %v837_v10  ;;  %v920_v21 = vrot.slane %v2204_v9, %v873_v53  ;;  %v1784_v48 = vld [vmem:[#allocation10 + $0x8] sm:$0xff]  }
  0xb6   :  { %v513_v61 = vmul.f32 %v512_v59, %v510_v3  ;;  %v940_v2 = vrot.slane %v2207_v35, %v873_v53  ;;  %v874_v30 = vrot.slane %v2255_v40, %v873_v53  ;;  %vm221_vm3 = vcmp.eq.f32.partialorder %v2299_v58, 0.0  ;;  %v1783_v40 = vld [vmem:[#allocation10 + $0x48] sm:$0xff]   ;;  %v1787_v3 = vld [vmem:[#allocation10] sm:$0xff]  }
  0xb7   :  { %v950_v23 = vadd.f32 %v947_v8, %v944_v51  ;;  %v2301_v41 = vadd.f32 %v901_v6, %v898_v56  ;;  %v222_v26 = vand.u32 2147483648, %v2299_v58  ;;  %vm528_vm4 = vcmp.eq.s32.totalorder %v523_v46, 2 }
  0xb8   :  { %v514_v11 = vxor.u32 2147483648, %v513_v61  ;;  %vm843_vm5 = vcmp.eq.s32.totalorder %v838_v20, 2  ;;  %vm525_vm6 = vcmp.eq.s32.totalorder %v523_v46, 0  ;;  %vm840_vm7 = vcmp.eq.s32.totalorder %v838_v20, 0 }
  0xb9   :  { %v1053_v7 = vpack.c.bf16 %v950_v23, %v950_v23  ;;  %v1808_v37 = vpop.eup %1807  ;;  %vm524_vm8 = vcmp.lt.s32.totalorder %v523_v46, 2  ;;  %vm839_vm9 = vcmp.lt.s32.totalorder %v838_v20, 2  ;;  %v926_v49 = vmul.f32 %v920_v21, %v860_v19 }
  0xba   :  { %v515_v18 = vsel %vm432_vm14, %v514_v11, %v513_v61  ;;  %v218_v5 = vmul.f32 %v1808_v37, %v2299_v58  ;;  %v880_v54 = vmul.f32 %v874_v30, %v855_v28  ;;  %v894_v60 = vrot.slane %v2271_v12, %v873_v53  ;;  %v1779_v11 = vld [vmem:[#allocation10 + $0x98] sm:$0xff]  }
  0xbb   :  { %1233 = vmatmul.mubr.bf16.vlgmr.msra.gmra.mxu0 %v1053_v7  ;;  %v518_v34 = vsel %vm431_vm15, %v2049_v44, %v515_v18  ;;  %v946_v0 = vadd.f32 %v940_v2, %v926_v49  ;;  %v1050_v44 = vpack.c.bf16 %v2301_v41, %v2301_v41  ;;  %v1770_v7 = vld [vmem:[#allocation10 + $0xb0] sm:$0xff]   ;;  %v1785_v18 = vld [vmem:[#allocation10 + $0x88] sm:$0xff]   ;;  %v1611_v2 = vld [vmem:[%s2350_s5] ss:$0 sm:$0xff] }
  0xbc   :  { %1644 = vmatpush3.bf16.msra.mxu0 %v1766_v13  ;;  %1456 = vmatprep.mubr.bf16.mxu0 %v1051_v15  ;;  %1809 = vcosq.f32 %v518_v34  ;;  %v220_v33 = vsel %vm219_vm1, %v2299_v58, %v218_v5  ;;  %v900_v58 = vadd.f32 %v894_v60, %v880_v54  ;;  %v1767_v13 = vld [vmem:[#allocation10 + $0xb8] sm:$0xff]   ;;  %v1782_v41 = vld [vmem:[#allocation10 + $0x90] sm:$0xff]  }
  0xbd   :  { %1645 = vmatprep.subr.bf16.mxu0 %v1768_v47  ;;  %1811 = vsinq.f32 %v518_v34  ;;  %v223_v38 = vsel %vm221_vm3, %v222_v26, %v220_v33  ;;  %v1776_v47 = vld [vmem:[#allocation10 + $0xa0] sm:$0xff]  }
  0xc0   :  { %1646 = vmatpush3.bf16.msra.mxu0 %v1769_v16  ;;  %v1788_v16 = vld [vmem:[#allocation10 + $0x80] sm:$0xff]  }
  0xc1   :  { %1647 = vmatprep.subr.bf16.mxu0 %v1771_v55 }
  0xc4   :  { %1648 = vmatpush3.bf16.msra.mxu0 %v1772_v29 }
  0xc5   :  { %1649 = vmatprep.subr.bf16.mxu0 %v1774_v52 }
  0xc8   :  { %1650 = vmatpush3.bf16.msra.mxu0 %v1775_v63 }
  0xc9   :  { %1651 = vmatprep.subr.bf16.mxu0 %v1777_v39  ;;  %v1810_v31 = vpop.eup %1809 }
  0xca   :  { %v1812_v32 = vpop.eup %1811  ;;  %v529_v9 = vxor.u32 2147483648, %v1810_v31 }
  0xcb   :  { %v526_v35 = vxor.u32 2147483648, %v1812_v32 }
  0xcc   :  { %1652 = vmatpush3.bf16.msra.mxu0 %v1778_v14  ;;  %v530_v57 = vsel %vm528_vm4, %v529_v9, %v1812_v32  ;;  %v845_v4 = vsel %vm843_vm5, %v529_v9, %v1812_v32 }
  0xcd   :  { %1653 = vmatprep.subr.bf16.mxu0 %v1780_v24  ;;  %v527_v36 = vsel %vm525_vm6, %v1810_v31, %v526_v35  ;;  %v842_v42 = vsel %vm840_vm7, %v1810_v31, %v526_v35 }
  0xce   :  { %v531_v27 = vsel %vm524_vm8, %v527_v36, %v530_v57  ;;  %v846_v45 = vsel %vm839_vm9, %v842_v42, %v845_v4 }
  0xcf   :  { %v532_v51 = vsel %vm522_vm2, nan, %v531_v27  ;;  %v847_v56 = vsel %vm522_vm2, nan, %v846_v45 }
  0xd0   :  { %1654 = vmatpush3.bf16.msra.mxu0 %v1781_v43  ;;  %v535_v59 = vmul.f32 %v532_v51, %v223_v38  ;;  %v850_v12 = vmul.f32 %v847_v56, %v223_v38 }
  0xd1   :  { %1655 = vmatprep.subr.bf16.mxu0 %v1783_v40 }
  0xd2   :  { %v903_v6 = vmul.f32 0.25, %v535_v59  ;;  %v949_v8 = vmul.f32 0.25, %v850_v12 }
  0xd4   :  { %1656 = vmatpush3.bf16.msra.mxu0 %v1784_v48  ;;  %v952_v23 = vadd.f32 %v949_v8, %v946_v0  ;;  %v906_v61 = vadd.f32 %v903_v6, %v900_v58 }
  0xd5   :  { %1657 = vmatprep.subr.bf16.mxu0 %v1786_v50 }
  0xd6   :  { %v1055_v15 = vpack.c.bf16 %v952_v23, %v952_v23  ;;  %v1052_v17 = vpack.c.bf16 %v906_v61, %v906_v61 }
  0xd8   :  { %1658 = vmatpush3.bf16.msra.mxu0 %v1787_v3  ;;  %1691 = vmatmul.mubr.bf16.vlgmr.msra.gmra.mxu1 %v1055_v15 }
  0xd9   :  { %1695 = vmatpush3.bf16.msra.mxu1 %v1767_v13  ;;  %1710 = vmatprep.mubr.msk.bf16.mxu1 %vm1928_vm0, %v1927_v1 }
  0xda   :  { %1696 = vmatprep.subr.bf16.mxu1 %v1927_v1 }
  0xdb   :  { %1457 = vmatmul.mubr.bf16.vlgmr.msra.gmra.mxu0 %v1050_v44 }
  0xdd   :  { %1697 = vmatpush3.bf16.msra.mxu1 %v1770_v7 }
  0xde   :  { %1698 = vmatprep.subr.bf16.mxu1 %v1927_v1 }
  0xe1   :  { %1699 = vmatpush3.bf16.msra.mxu1 %v1773_v62 }
  0xe2   :  { %1700 = vmatprep.subr.bf16.mxu1 %v1927_v1 }
  0xe5   :  { %1701 = vmatpush3.bf16.msra.mxu1 %v1776_v47 }
  0xe6   :  { %1702 = vmatprep.subr.bf16.mxu1 %v1927_v1 }
  0xe9   :  { %1703 = vmatpush3.bf16.msra.mxu1 %v1779_v11 }
  0xea   :  { %1704 = vmatprep.subr.bf16.mxu1 %v1927_v1 }
  0xed   :  { %1705 = vmatpush3.bf16.msra.mxu1 %v1782_v41 }
  0xee   :  { %1706 = vmatprep.subr.bf16.mxu1 %v1927_v1 }
  0xf1   :  { %1707 = vmatpush3.bf16.msra.mxu1 %v1785_v18 }
  0xf2   :  { %1708 = vmatprep.subr.bf16.mxu1 %v1927_v1 }
  0xf5   :  { %1709 = vmatpush3.bf16.msra.mxu1 %v1788_v16 }
  0xf8   :  { %1711 = vmatmul.mubr.bf16.vlgmr.msra.gmra.mxu1 %v1052_v17 }
 0x17b   :  { %v1628_v34 = vpop.f32.mrf.mxu0 }
 0x17d   :  { %v1629_v55 = vpop.f32.mrf.mxu0 }
 0x17e   :  { %v1630_v20 = vadd.f32 %v1629_v55, %v1628_v34 }
 0x17f   :  { %v1631_v22 = vpop.f32.mrf.mxu0 }
 0x181   :  { %v1632_v29 = vpop.f32.mrf.mxu0 }
 0x198   :  { %v1274_v52 = vpop.f32.mrf.mxu1 }
 0x199   :  { %v1275_v14 = vadd.f32 %v1630_v20, %v1274_v52 }
 0x19a   :  { %v1692_v10 = vpop.f32.mrf.mxu1 }
 0x19b   :  { %v1659_v63 = vpop.f32.mrf.mxu0 }
 0x19c   :  { %v1277_v37 = vpop.f32.mrf.mxu1 }
 0x19d   :  { %v1660_v53 = vpop.f32.mrf.mxu0 }
 0x19e   :  { %v1693_v39 = vpop.f32.mrf.mxu1  ;;  %v1661_v5 = vadd.f32 %v1660_v53, %v1659_v63 }
 0x19f   :  { %v1662_v25 = vpop.f32.mrf.mxu0 }
 0x1a0   :  { %v1459_v19 = vadd.f32 %v1661_v5, %v1275_v14 }
 0x1a1   :  { %v1663_v46 = vpop.f32.mrf.mxu0 }
 0x1b8   :  { %v1498_v1 = vpop.f32.mrf.mxu1 }
 0x1b9   :  { %v1499_v21 = vadd.f32 %v1498_v1, %v1459_v19 }
 0x1ba   :  { %v1712_v24 = vpop.f32.mrf.mxu1 }
 0x1bb   :  { %v1517_v30 = vadd.f32 %v1611_v2, %v1499_v21 }
 0x1bc   :  { %v1501_v28 = vpop.f32.mrf.mxu1 }
 0x1bd   :  { %1518 = vst [vmem:[#allocation12] sm:$0xff] %v1517_v30 }
 0x1be   :  { %v1713_v31 = vpop.f32.mrf.mxu1 }
 0x1bf   :  { %1904 = shalt.err (!%p1901_p10)
}
 0x1c0   :  { %1528 = dma.vmem_to_hbm [thread:$0]  %s1526_s19, 128, %s2351_s6, [#allocation6]  }
 0x1c1   :  { %1919 = dma.done.wait [#allocation6], 128  }
 0x1c2   :  { %1920 = vsyncadd [#allocation6], 4294967168 }
 0x1c3   :  { %1532 = vsyncpa [#allocation5], 1 }
 0x1c4   :  { %1533 = vsyncpa [#allocation8], 1 }
 0x1c5   :  { %1534 = vsyncpa [#allocation11], 1 }
 0x1c6   :  { %1535 = vsyncpa [#allocation6], 1 }

</bundles_post_ra>
